<compile_context>
chip_gen: v5e
topology: v5e:2x2
jax: 0.10.0
libtpu: 0.0.40
codegen_flags: <defaults>
</compile_context>

<pallas_src>
import functools
import math

import jax
import jax.numpy as jnp
from jax.experimental import pallas as pl
from jax.experimental.pallas import tpu as pltpu


# ----------------------------------------------------------------------------
# Pallas fused matmul (+bias +optional ReLU) kernel — the hot path.
# ----------------------------------------------------------------------------
def _mm_kernel(a_ref, b_ref, bias_ref, o_ref, *, act):
    acc = jnp.dot(a_ref[...], b_ref[...], preferred_element_type=jnp.float32)
    acc = acc + bias_ref[...]
    if act == "relu":
        acc = jnp.maximum(acc, 0.0)
    o_ref[...] = acc.astype(o_ref.dtype)


def _round_up(x, m):
    return (x + m - 1) // m * m


def _cdiv(a, b):
    return -(-a // b)


def _pick_tiles(M, K, N):
    """Padding-aware tile selection.

    tn: 256 only when it does not add padding vs. 128 (lane-dense RHS/out).
    tm: largest cap in {512,384,256,128} whose double-buffered bf16 footprint
        (A + B + out tiles) stays under ~20 MiB, then shrunk to minimise the
        ragged-edge waste of the last M block.
    """
    tn = 256 if _round_up(N, 256) <= _round_up(N, 128) else 128
    budget = 20 * 1024 * 1024
    tm = 128
    for cap in (512, 384, 256, 128):
        nb = _cdiv(M, cap)
        cand = min(cap, _round_up(_cdiv(M, nb), 8))
        vmem = 2 * 2 * cand * K + 2 * 2 * K * tn + 2 * 2 * cand * tn
        if vmem <= budget:
            tm = cand
            break
    return tm, tn


@functools.lru_cache(maxsize=None)
def _mm_call(M, K, N, tm, tn, act, out_dtype_name):
    kernel = functools.partial(_mm_kernel, act=act)
    return pl.pallas_call(
        kernel,
        out_shape=jax.ShapeDtypeStruct((M, N), jnp.dtype(out_dtype_name)),
        grid_spec=pltpu.PrefetchScalarGridSpec(
            num_scalar_prefetch=0,
            grid=(_cdiv(M, tm), _cdiv(N, tn)),
            in_specs=[
                # whole-K block: last dim equals the full array dim -> no K pad.
                pl.BlockSpec((tm, K), lambda i, j: (i, 0)),
                pl.BlockSpec((K, tn), lambda i, j: (0, j)),
                pl.BlockSpec((1, tn), lambda i, j: (0, j)),
            ],
            out_specs=pl.BlockSpec((tm, tn), lambda i, j: (i, j)),
        ),
        compiler_params=pltpu.CompilerParams(
            dimension_semantics=("parallel", "parallel"),
            vmem_limit_bytes=32 * 1024 * 1024),
    )


def matmul_bias_act(a, b, bias=None, act="none", out_dtype=jnp.bfloat16):
    """a:(M,K) @ b:(K,N) + bias, optional ReLU.  bf16 operands, f32 accumulate."""
    M, K = a.shape
    K2, N = b.shape
    assert K == K2
    if bias is None:
        bias = jnp.zeros((N,), jnp.float32)
    tm, tn = _pick_tiles(M, K, N)
    fn = _mm_call(M, K, N, tm, tn, act, jnp.dtype(out_dtype).name)
    return fn(a.astype(jnp.bfloat16),
              b.astype(jnp.bfloat16),
              bias.astype(jnp.float32).reshape(1, N))


def dense(x, w, b, act="none"):
    # Tiny-M (M == batch) head matmuls: pallas launch + padding overhead would
    # dominate; XLA dot is faster here (per perf review).
    y = jnp.dot(x.astype(jnp.float32), w.astype(jnp.float32)) + b
    if act == "relu":
        y = jnp.maximum(y, 0.0)
    return y


# ----------------------------------------------------------------------------
# Conv / deconv via im2col + Pallas matmul.
# ----------------------------------------------------------------------------
@functools.partial(jax.jit, static_argnames=("stride", "padding", "act"))
def _conv2d_impl(x, w, bias, *, stride, padding, act):
    kh, kw, cin, cout = w.shape
    n, h, wd, c = x.shape
    assert c == cin
    sh, sw = stride
    ph, pw = padding
    x = x.astype(jnp.bfloat16)               # build im2col directly in bf16
    xp = jnp.pad(x, ((0, 0), (ph, ph), (pw, pw), (0, 0)))
    ho = (h + 2 * ph - kh) // sh + 1
    wo = (wd + 2 * pw - kw) // sw + 1
    cols = [xp[:, i:i + sh * ho:sh, j:j + sw * wo:sw, :]
            for i in range(kh) for j in range(kw)]
    patches = cols[0] if len(cols) == 1 else jnp.concatenate(cols, axis=-1)
    a = patches.reshape(n * ho * wo, kh * kw * cin)
    b = w.reshape(kh * kw * cin, cout)
    out = matmul_bias_act(a, b, bias, act=act, out_dtype=jnp.bfloat16)
    return out.reshape(n, ho, wo, cout)


def conv2d(x, w, bias=None, stride=1, padding=0, act="none"):
    """x: (N,H,W,Cin) NHWC, w: (kh,kw,Cin,Cout). Matches torch.nn.Conv2d."""
    if isinstance(stride, int):
        stride = (stride, stride)
    if isinstance(padding, int):
        padding = (padding, padding)
    if bias is None:
        bias = jnp.zeros((w.shape[-1],), jnp.float32)
    return _conv2d_impl(x, w, bias, stride=stride, padding=padding, act=act)


def conv_transpose2d_subpixel(x, w_eq, stride, padding, output_padding, act="none"):
    """torch.nn.ConvTranspose2d as a sub-pixel convolution (4 stride-1 phase
    convs + interleave) -> 4x fewer FLOPs than dilate+conv.
    Specialised to the only config used by the module: k=3, s=2, p=1, op=1."""
    kh, kw, cin, cout = w_eq.shape
    assert (kh, kw, stride, padding, output_padding) == (3, 3, 2, 1, 1)
    n, h, wd, c = x.shape
    assert c == cin
    x = x.astype(jnp.bfloat16)
    xr = jnp.pad(x, ((0, 0), (0, 0), (0, 1), (0, 0)))
    xb = jnp.pad(x, ((0, 0), (0, 1), (0, 0), (0, 0)))
    xbr = jnp.pad(x, ((0, 0), (0, 1), (0, 1), (0, 0)))
    ee = conv2d(x, w_eq[1:2, 1:2], None, 1, 0, act=act)        # y[2i,   2j  ]
    eo = conv2d(xr, w_eq[1:2, 0::2], None, 1, 0, act=act)      # y[2i,   2j+1]
    oe = conv2d(xb, w_eq[0::2, 1:2], None, 1, 0, act=act)      # y[2i+1, 2j  ]
    oo = conv2d(xbr, w_eq[0::2, 0::2], None, 1, 0, act=act)    # y[2i+1, 2j+1]
    row_e = jnp.stack([ee, eo], axis=3).reshape(n, h, 2 * wd, cout)
    row_o = jnp.stack([oe, oo], axis=3).reshape(n, h, 2 * wd, cout)
    return jnp.stack([row_e, row_o], axis=2).reshape(n, 2 * h, 2 * wd, cout)


# ----------------------------------------------------------------------------
# Pooling / resize / sampling glue (plain JAX).
# ----------------------------------------------------------------------------
def max_pool(x, k, stride):
    init = jnp.array(-jnp.inf, x.dtype)
    return jax.lax.reduce_window(
        x, init, jax.lax.max,
        (1, k, k, 1), (1, stride, stride, 1),
        ((0, 0), (0, 0), (0, 0), (0, 0)))


def avg_pool_3x3(x):
    # AvgPool2d(3, stride=1, padding=1, count_include_pad=False)
    pad = ((0, 0), (1, 1), (1, 1), (0, 0))
    zero = jnp.array(0, x.dtype)
    s = jax.lax.reduce_window(x, zero, jax.lax.add, (1, 3, 3, 1), (1, 1, 1, 1), pad)
    ones = jnp.ones_like(x[:, :, :, :1])
    cnt = jax.lax.reduce_window(ones, zero, jax.lax.add, (1, 3, 3, 1), (1, 1, 1, 1), pad)
    return s / cnt


def _interp_coords(out_size, in_size, align_corners):
    i = jnp.arange(out_size, dtype=jnp.float32)
    if align_corners:
        src = i * (in_size - 1) / max(out_size - 1, 1)
    else:
        src = jnp.maximum((i + 0.5) * (in_size / out_size) - 0.5, 0.0)
    i0 = jnp.clip(jnp.floor(src).astype(jnp.int32), 0, in_size - 1)
    i1 = jnp.minimum(i0 + 1, in_size - 1)
    frac = jnp.clip(src - i0.astype(jnp.float32), 0.0, 1.0)
    return i0, i1, frac


def interpolate_bilinear(x, out_h, out_w, align_corners):
    n, h, w, c = x.shape
    y0, y1, fy = _interp_coords(out_h, h, align_corners)
    x0, x1, fx = _interp_coords(out_w, w, align_corners)
    rows = (x[:, y0, :, :] * (1 - fy)[None, :, None, None]
            + x[:, y1, :, :] * fy[None, :, None, None])
    out = (rows[:, :, x0, :] * (1 - fx)[None, None, :, None]
           + rows[:, :, x1, :] * fx[None, None, :, None])
    return out


def affine_grid(T, H, W):
    # torch.nn.functional.affine_grid, align_corners=False
    xs = (jnp.arange(W, dtype=jnp.float32) * 2 + 1) / W - 1.0
    ys = (jnp.arange(H, dtype=jnp.float32) * 2 + 1) / H - 1.0
    gx, gy = jnp.meshgrid(xs, ys)                     # (H, W)
    base = jnp.stack([gx, gy, jnp.ones_like(gx)], axis=-1)
    return jnp.einsum('bij,hwj->bhwi', T, base)       # (B, H, W, 2)


def grid_sample_bilinear(x, grid):
    # torch grid_sample, mode='bilinear', padding_mode='zeros', align_corners=False
    n, h, w, c = x.shape
    gx, gy = grid[..., 0], grid[..., 1]
    ix = ((gx + 1) * w - 1) * 0.5
    iy = ((gy + 1) * h - 1) * 0.5
    x0 = jnp.floor(ix).astype(jnp.int32)
    y0 = jnp.floor(iy).astype(jnp.int32)
    x1, y1 = x0 + 1, y0 + 1
    wx1, wy1 = ix - x0, iy - y0
    wx0, wy0 = 1.0 - wx1, 1.0 - wy1

    def gather(yi, xi):
        valid = (xi >= 0) & (xi < w) & (yi >= 0) & (yi < h)
        xc = jnp.clip(xi, 0, w - 1)
        yc = jnp.clip(yi, 0, h - 1)
        vals = jax.vmap(lambda img, yy, xx: img[yy, xx, :])(x, yc, xc)
        return vals * valid[..., None].astype(x.dtype)

    return (gather(y0, x0) * (wy0 * wx0)[..., None]
            + gather(y0, x1) * (wy0 * wx1)[..., None]
            + gather(y1, x0) * (wy1 * wx0)[..., None]
            + gather(y1, x1) * (wy1 * wx1)[..., None])


# ----------------------------------------------------------------------------
# Deterministic parameter generation (kaiming fan_out / relu, bias = 0).
# ----------------------------------------------------------------------------
class Params:
    def __init__(self, seed=42):
        self.key = jax.random.PRNGKey(seed)
        self.n = 0

    def _next(self):
        k = jax.random.fold_in(self.key, self.n)
        self.n += 1
        return k

    def conv_w(self, kh, kw, cin, cout):
        std = math.sqrt(2.0 / (cout * kh * kw))
        return std * jax.random.normal(self._next(), (kh, kw, cin, cout), jnp.float32)

    def linear(self, cin, cout, zero=False):
        k = self._next()
        if zero:
            w = jnp.zeros((cin, cout), jnp.float32)
        else:
            w = math.sqrt(2.0 / cout) * jax.random.normal(k, (cin, cout), jnp.float32)
        return w, jnp.zeros((cout,), jnp.float32)


BN_EPS = 1e-3
_BN_SCALE = 1.0 / math.sqrt(1.0 + BN_EPS)   # eval BN (mean=0, var=1, gamma=1, beta=0)


def basic_conv(x, pg, cin, cout, k, stride=1, padding=0):
    if isinstance(k, int):
        k = (k, k)
    w = pg.conv_w(k[0], k[1], cin, cout) * _BN_SCALE
    return conv2d(x, w, None, stride=stride, padding=padding, act="relu")


def basic_deconv(x, pg, cin, cout, k, stride, padding, outpadding):
    w = pg.conv_w(k, k, cin, cout) * _BN_SCALE
    return conv_transpose2d_subpixel(x, w, stride, padding, outpadding, act="relu")


# ----------------------------------------------------------------------------
# Inception-v4 blocks (standard definitions).
# ----------------------------------------------------------------------------
def mixed_3a(x, pg):
    return jnp.concatenate([max_pool(x, 3, 2),
                            basic_conv(x, pg, 64, 96, 3, stride=2)], axis=-1)


def mixed_4a(x, pg):
    b0 = basic_conv(x, pg, 160, 64, 1)
    b0 = basic_conv(b0, pg, 64, 96, 3)
    b1 = basic_conv(x, pg, 160, 64, 1)
    b1 = basic_conv(b1, pg, 64, 64, (1, 7), padding=(0, 3))
    b1 = basic_conv(b1, pg, 64, 64, (7, 1), padding=(3, 0))
    b1 = basic_conv(b1, pg, 64, 96, 3)
    return jnp.concatenate([b0, b1], axis=-1)


def mixed_5a(x, pg):
    return jnp.concatenate([basic_conv(x, pg, 192, 192, 3, stride=2),
                            max_pool(x, 3, 2)], axis=-1)


def inception_a(x, pg):
    b0 = basic_conv(x, pg, 384, 96, 1)
    b1 = basic_conv(x, pg, 384, 64, 1)
    b1 = basic_conv(b1, pg, 64, 96, 3, padding=1)
    b2 = basic_conv(x, pg, 384, 64, 1)
    b2 = basic_conv(b2, pg, 64, 96, 3, padding=1)
    b2 = basic_conv(b2, pg, 96, 96, 3, padding=1)
    b3 = basic_conv(avg_pool_3x3(x), pg, 384, 96, 1)
    return jnp.concatenate([b0, b1, b2, b3], axis=-1)


def reduction_a(x, pg):
    b0 = basic_conv(x, pg, 384, 384, 3, stride=2)
    b1 = basic_conv(x, pg, 384, 192, 1)
    b1 = basic_conv(b1, pg, 192, 224, 3, padding=1)
    b1 = basic_conv(b1, pg, 224, 256, 3, stride=2)
    return jnp.concatenate([b0, b1, max_pool(x, 3, 2)], axis=-1)


def inception_b(x, pg):
    b0 = basic_conv(x, pg, 1024, 384, 1)
    b1 = basic_conv(x, pg, 1024, 192, 1)
    b1 = basic_conv(b1, pg, 192, 224, (1, 7), padding=(0, 3))
    b1 = basic_conv(b1, pg, 224, 256, (7, 1), padding=(3, 0))
    b2 = basic_conv(x, pg, 1024, 192, 1)
    b2 = basic_conv(b2, pg, 192, 192, (7, 1), padding=(3, 0))
    b2 = basic_conv(b2, pg, 192, 224, (1, 7), padding=(0, 3))
    b2 = basic_conv(b2, pg, 224, 224, (7, 1), padding=(3, 0))
    b2 = basic_conv(b2, pg, 224, 256, (1, 7), padding=(0, 3))
    b3 = basic_conv(avg_pool_3x3(x), pg, 1024, 128, 1)
    return jnp.concatenate([b0, b1, b2, b3], axis=-1)


def reduction_b(x, pg):
    b0 = basic_conv(x, pg, 1024, 192, 1)
    b0 = basic_conv(b0, pg, 192, 192, 3, stride=2)
    b1 = basic_conv(x, pg, 1024, 256, 1)
    b1 = basic_conv(b1, pg, 256, 256, (1, 7), padding=(0, 3))
    b1 = basic_conv(b1, pg, 256, 320, (7, 1), padding=(3, 0))
    b1 = basic_conv(b1, pg, 320, 320, 3, stride=2)
    return jnp.concatenate([b0, b1, max_pool(x, 3, 2)], axis=-1)


def inception_c(x, pg):
    b0 = basic_conv(x, pg, 1536, 256, 1)
    b1 = basic_conv(x, pg, 1536, 384, 1)
    b1a = basic_conv(b1, pg, 384, 256, (1, 3), padding=(0, 1))
    b1b = basic_conv(b1, pg, 384, 256, (3, 1), padding=(1, 0))
    b2 = basic_conv(x, pg, 1536, 384, 1)
    b2 = basic_conv(b2, pg, 384, 448, (3, 1), padding=(1, 0))
    b2 = basic_conv(b2, pg, 448, 512, (1, 3), padding=(0, 1))
    b2a = basic_conv(b2, pg, 512, 256, (1, 3), padding=(0, 1))
    b2b = basic_conv(b2, pg, 512, 256, (3, 1), padding=(1, 0))
    b3 = basic_conv(avg_pool_3x3(x), pg, 1536, 256, 1)
    return jnp.concatenate([b0, b1a, b1b, b2a, b2b, b3], axis=-1)


# ----------------------------------------------------------------------------
# DeepPrint_stn sub-networks.
# ----------------------------------------------------------------------------
def localization(x, pg):
    s = 1.0 / math.sqrt(1.0 + 1e-5)   # localization BNs use eps=1e-5
    x = conv2d(x, pg.conv_w(5, 5, 1, 24) * s, None, 1, 2, act="relu")
    x = max_pool(x, 2, 2)
    x = conv2d(x, pg.conv_w(3, 3, 24, 32) * s, None, 1, 1, act="relu")
    x = max_pool(x, 2, 2)
    x = conv2d(x, pg.conv_w(3, 3, 32, 48) * s, None, 1, 1, act="relu")
    x = max_pool(x, 2, 2)
    x = conv2d(x, pg.conv_w(3, 3, 48, 64) * s, None, 1, 1, act="relu")
    x = max_pool(x, 2, 2)                                        # (B, 8, 8, 64)
    x = jnp.transpose(x, (0, 3, 1, 2)).reshape(x.shape[0], -1)   # torch NCHW flatten
    w1, b1 = pg.linear(64 * 8 * 8, 64)
    x = dense(x, w1, b1, act="relu")
    w2, b2 = pg.linear(64, 3, zero=True)   # localization[-1].weight zeroed in __init__
    return dense(x, w2, b2)


def stem(x, pg):
    x = basic_conv(x, pg, 1, 32, 3, stride=2)               # 299 -> 149
    x = basic_conv(x, pg, 32, 32, 3)                        # 147
    x = basic_conv(x, pg, 32, 64, 3, padding=1)             # 147
    x = mixed_3a(x, pg)                                     # 73 x 73 x 160
    x = mixed_4a(x, pg)                                     # 71 x 71 x 192
    x = mixed_5a(x, pg)                                     # 35 x 35 x 384
    return x


def texture_branch(x, pg):
    for _ in range(4):
        x = inception_a(x, pg)
    x = reduction_a(x, pg)                                  # 17 x 17 x 1024
    for _ in range(7):
        x = inception_b(x, pg)
    x = reduction_b(x, pg)                                  # 8 x 8 x 1536
    for _ in range(3):
        x = inception_c(x, pg)
    return x


def minutiae_d_branch(x, pg):
    x = basic_deconv(x, pg, 384, 128, 3, stride=2, padding=1, outpadding=1)   # 70
    x = basic_conv(x, pg, 128, 128, 7)                                        # 64
    x = basic_deconv(x, pg, 128, 32, 3, stride=2, padding=1, outpadding=1)    # 128
    w = pg.conv_w(3, 3, 32, 6)
    return conv2d(x, w, jnp.zeros((6,), jnp.float32), 1, 1, act="relu")       # (B,128,128,6)


def minutiae_f_convs(x, pg):
    x = basic_conv(x, pg, 384, 768, 3, padding=1)
    x = basic_conv(x, pg, 768, 768, 3, stride=2, padding=1)
    x = basic_conv(x, pg, 768, 896, 3, padding=1)
    x = basic_conv(x, pg, 896, 1024, 3, stride=2, padding=1)
    return jnp.mean(x.astype(jnp.float32), axis=(1, 2))     # global avg pool -> (B,1024)


# ----------------------------------------------------------------------------
# Full forward pass.
# ----------------------------------------------------------------------------
def deep_print_stn_forward(inp, pg, crop_shape=(64, 64), ndim_feat=96, num_classes=512):
    """inp: (B, 1, H, W) float32 (PyTorch NCHW convention)."""
    B, C, H, W = inp.shape
    x_nhwc = jnp.transpose(inp, (0, 2, 3, 1))

    # ---- stn ----
    x_loc = interpolate_bilinear(x_nhwc, 128, 128, align_corners=False)
    z = localization(x_loc, pg)
    pose = jnp.clip(z, -1.0, 1.0)
    theta = jnp.deg2rad(pose[:, 2] * 60.0)
    cos_t, sin_t = jnp.cos(theta), jnp.sin(theta)
    scale_x = (crop_shape[1] - 1) * 1.0 / (W - 1)
    scale_y = (crop_shape[0] - 1) * 1.0 / (H - 1)
    row0 = jnp.stack([scale_x * cos_t, scale_x * sin_t, pose[:, 0]], axis=1)
    row1 = jnp.stack([scale_y * -sin_t, scale_y * cos_t, pose[:, 1]], axis=1)
    T = jnp.stack([row0, row1], axis=1)                     # (B, 2, 3)
    grid = affine_grid(T, crop_shape[0], crop_shape[1])
    input_stn = grid_sample_bilinear(x_nhwc, grid)          # (B, ch, cw, 1)

    # ---- backbone ----
    x = interpolate_bilinear(input_stn, 299, 299, align_corners=True)
    x = stem(x, pg)                                         # (B, 35, 35, 384)

    texture = texture_branch(x, pg)                         # (B, 8, 8, 1536)
    wt, bt = pg.linear(1536, ndim_feat)
    texture_f = dense(jnp.mean(texture.astype(jnp.float32), axis=(1, 2)), wt, bt)
    wtp, btp = pg.linear(ndim_feat, num_classes)
    texture_p = dense(texture_f, wtp, btp)

    m_e = x
    for _ in range(3):
        m_e = inception_a(m_e, pg)                          # (B, 35, 35, 384)
    minutiae_d = minutiae_d_branch(m_e, pg)                 # (B, 128, 128, 6)
    wm, bm = pg.linear(1024, ndim_feat)
    minutiae_f = dense(minutiae_f_convs(m_e, pg), wm, bm)
    wmp, bmp = pg.linear(ndim_feat, num_classes)
    minutiae_p = dense(minutiae_f, wmp, bmp)

    minu_map = jnp.transpose(minutiae_d.astype(jnp.float32), (0, 3, 1, 2))  # NCHW
    aligned = jnp.transpose(input_stn, (0, 3, 1, 2))
    return {
        'text_f': texture_f,
        'minu_f': minutiae_f,
        'text_p': texture_p,
        'minu_p': minutiae_p,
        'text_label': jnp.argmax(texture_p, axis=1),
        'minu_label': jnp.argmax(minutiae_p, axis=1),
        'minu_map': minu_map,
        'minu_lst': (minu_map[:, 0:3], minu_map[:, 3:6]),
        'aligned': aligned,
        'pose': pose,
    }


if __name__ == "__main__":
    key = jax.random.PRNGKey(0)
    # small input; internal resolutions (128x128 / 299x299) are fixed by the module.
    x = jax.random.normal(key, (2, 1, 64, 64), dtype=jnp.float32)
    pg = Params(seed=42)
    out = deep_print_stn_forward(x, pg, crop_shape=(64, 64), ndim_feat=96, num_classes=512)
    jax.block_until_ready(out)
    assert out['text_f'].shape == (2, 96)
    assert out['minu_f'].shape == (2, 96)
    assert out['text_p'].shape == (2, 512)
    assert out['minu_map'].shape == (2, 6, 128, 128)
    assert out['aligned'].shape == (2, 1, 64, 64)
    assert out['pose'].shape == (2, 3)
    print("KERNEL_OK")
</pallas_src>

<mosaic_0001>
module attributes {stable_mosaic.version = 11 : i64} {
  func.func @_mm_kernel(%arg0: i32, %arg1: i32, %arg2: memref<512x25xbf16, #tpu.memory_space<vmem>>, %arg3: memref<25x128xbf16, #tpu.memory_space<vmem>>, %arg4: memref<1x128xf32, #tpu.memory_space<vmem>>, %arg5: memref<512x128xbf16, #tpu.memory_space<vmem>>) attributes {dimension_semantics = [#tpu.dimension_semantics<parallel>, #tpu.dimension_semantics<parallel>], iteration_bounds = array<i64: 64, 1>, scalar_prefetch = 0 : i64, scratch_operands = 0 : i64, tpu.core_type = #tpu.core_type<tc>, window_params = [{transform_indices = @transform_0, window_bounds = array<i64: 512, 25>}, {transform_indices = @transform_1, window_bounds = array<i64: 25, 128>}, {transform_indices = @transform_2, window_bounds = array<i64: 1, 128>}, {transform_indices = @transform_3, window_bounds = array<i64: 512, 128>}]} {
    %c0 = arith.constant 0 : index
    %c0_0 = arith.constant 0 : index
    %0 = vector.load %arg2[%c0, %c0_0] : memref<512x25xbf16, #tpu.memory_space<vmem>>, vector<512x25xbf16>
    %c0_1 = arith.constant 0 : index
    %c0_2 = arith.constant 0 : index
    %1 = vector.load %arg3[%c0_1, %c0_2] : memref<25x128xbf16, #tpu.memory_space<vmem>>, vector<25x128xbf16>
    %cst = arith.constant dense<0.000000e+00> : vector<512x128xf32>
    %2 = tpu.matmul %0, %1, %cst {dimension_numbers = #tpu.dot_dimension_numbers<[1], [0], [0], [1], [0, 0, 1, 1], [], []>} : vector<512x25xbf16>, vector<25x128xbf16>, vector<512x128xf32> -> vector<512x128xf32>
    %c0_3 = arith.constant 0 : index
    %c0_4 = arith.constant 0 : index
    %3 = vector.load %arg4[%c0_3, %c0_4] : memref<1x128xf32, #tpu.memory_space<vmem>>, vector<1x128xf32>
    %4 = vector.broadcast %3 : vector<1x128xf32> to vector<512x128xf32>
    %5 = arith.addf %2, %4 : vector<512x128xf32>
    %cst_5 = arith.constant 0.000000e+00 : f32
    %6 = vector.broadcast %cst_5 : f32 to vector<512x128xf32>
    %7 = arith.maximumf %5, %6 : vector<512x128xf32>
    %8 = arith.truncf %7 : vector<512x128xf32> to vector<512x128xbf16>
    %c0_6 = arith.constant 0 : index
    %c0_7 = arith.constant 0 : index
    %9 = vector.load %arg5[%c0_6, %c0_7] : memref<512x128xbf16, #tpu.memory_space<vmem>>, vector<512x128xbf16>
    tpu.vector_store %arg5[%c0_6, %c0_7], %8 {strides = array<i32>} : memref<512x128xbf16, #tpu.memory_space<vmem>>, vector<512x128xbf16>,
    return
  }
  func.func @transform_0(%arg0: i32, %arg1: i32) -> (i32, i32) {
    %c0_i32 = arith.constant 0 : i32
    %c0_i32_0 = arith.constant 0 : i32
    return %arg0, %c0_i32 : i32, i32
  }
  func.func @transform_1(%arg0: i32, %arg1: i32) -> (i32, i32) {
    %c0_i32 = arith.constant 0 : i32
    %c0_i32_0 = arith.constant 0 : i32
    return %c0_i32, %arg1 : i32, i32
  }
  func.func @transform_2(%arg0: i32, %arg1: i32) -> (i32, i32) {
    %c0_i32 = arith.constant 0 : i32
    %c0_i32_0 = arith.constant 0 : i32
    return %c0_i32, %arg1 : i32, i32
  }
  func.func @transform_3(%arg0: i32, %arg1: i32) -> (i32, i32) {
    %c0_i32 = arith.constant 0 : i32
    return %arg0, %arg1 : i32, i32
  }
}

</mosaic_0001>

<bundles_post_ra>
// kernel: _conv2d_impl.1
= control target key start
LH: loop header
LB: loop body
LE: loop exit
PB: predicated region body
PF: predicated region fallthrough
CT: control target
= control target key end

     0   :  { %s1519_s12 = smov 0   ;;  %s1521_s13 = smov 0   ;;  %s1737_s0 = inlined_call_operand.vmem [shape: bf16[32768,25], index: 0, kind: input, shape index: {}]   ;;  %s1738_s1 = inlined_call_operand.vmem [shape: bf16[25,24], index: 1, kind: input, shape index: {}]   ;;  %s1739_s2 = inlined_call_operand.vmem [shape: f32[1,24], index: 2, kind: input, shape index: {}]   ;;  %s1740_s3 = inlined_call_operand.vmem [shape: bf16[32768,24], index: 3, kind: output, shape index: {}]  }
   0x1   :  { %s1523_s14 = smov 0  }
   0x2 LB: > { %s25_s15 = sadd.s32 1, %s1492_s13  ;;  %p1042_p0 = scmp.ge.s32.totalorder %s1496_s14, 1  ;;  %s1496_s14 = sphi %s1523_s14, %s13_s14   ;;  %s1492_s13 = sphi %s1521_s13, %s1742_s13   ;;  %s1488_s12 = sphi %s1519_s12, %s1741_s12  }
   0x3   : > { %p27_p1 = scmp.ge.s32.totalorder %s25_s15, 64  ;;  %p169_p2 = scmp.lt.s32.totalorder %s1496_s14, 65 }
   0x5   : > { %s1744_s15 = smov (%p27_p1, %s25_s15), 0  ;;  %p170_p3 = pnand %p1042_p0, %p169_p2 }
   0x6   : > { %s1043_s20 = sshll.u32 (!%p170_p3), %s1488_s12, 6 }
   0x7   : > { %173 = sbr.rel (%p170_p3) target bundleno = 286 (0x11e), region = 32  ;;  %p204_p4 = scmp.lt.s32.totalorder (!%p170_p3), %s1043_s20, 4095 }
   0xc   : > { %v1181_v0 = vld [vmem:[%s1738_s1 + $0x8] sm:$0xf]  ;;  %v1250_v1 = vld [vmem:[%s1738_s1 + $0x8] sm:$0x10]  ;;  %vm566_vm0 = vcmask 1043456   ;;  %vm567_vm1 = vcmask 1044480  }
   0xd   : > { %v1182_v2 = vor.u32 %v1250_v1, %v1181_v0  ;;  %v1498_v3 = vmov 65535   ;;  %s1746_s20 = smov (!%p204_p4, %s1043_s20), 4095  ;;  %v1249_v7 = vld [vmem:[%s1738_s1] sm:$0xff]  ;;  %vm469_vm2 = vcmask 203776  }
   0xe   : > { %v568_v4 = vsel %vm566_vm0, 4294967295, %v1498_v3  ;;  %s1044_s23 = sshll.u32 %s1746_s20, 2  ;;  %v1623_v42 = vld [vmem:[%s1739_s2] ss:$0 sm:$0xff] }
   0xf   : > { %v569_v5 = vsel %vm567_vm1, %v568_v4, 0  ;;  %s1554_s26 = scalar_lea.vmem %s1737_s0, %s1044_s23  ;;  %s1634_s4 = scalar_lea.vmem %s1740_s3, %s1044_s23 }
  0x10   : > { %v571_v6 = vand.u32 %v1182_v2, %v569_v5  ;;  %v1217_v8 = vld [vmem:[%s1554_s26] sm:$0xff]  ;;  %v1218_v12 = vld [vmem:[%s1554_s26 + $0x8] sm:$0xff]  ;;  %v1219_v16 = vld [vmem:[%s1554_s26 + $0x10] sm:$0xff] }
  0x11   : > { %v1225_v9 = vld [vmem:[%s1554_s26 + $0x40] sm:$0xff]  ;;  %v1226_v13 = vld [vmem:[%s1554_s26 + $0x48] sm:$0xff]  ;;  %v1227_v17 = vld [vmem:[%s1554_s26 + $0x50] sm:$0xff] }
  0x12   : > { %579 = vmatpush.bf16.msra.mxu0 %v571_v6  ;;  %1442 = vmatpush.bf16.msra.mxu1 %v571_v6  ;;  %v1233_v10 = vld [vmem:[%s1554_s26 + $0x80] sm:$0xff]  ;;  %v1234_v14 = vld [vmem:[%s1554_s26 + $0x88] sm:$0xff]  ;;  %v1235_v18 = vld [vmem:[%s1554_s26 + $0x90] sm:$0xff] }
  0x13   : > { %1443 = vmatpush.bf16.msra.mxu2 %v571_v6  ;;  %1444 = vmatpush.bf16.msra.mxu3 %v571_v6  ;;  %v1241_v11 = vld [vmem:[%s1554_s26 + $0xc0] sm:$0xff]  ;;  %v1242_v15 = vld [vmem:[%s1554_s26 + $0xc8] sm:$0xff]  ;;  %v1243_v19 = vld [vmem:[%s1554_s26 + $0xd0] sm:$0xff] }
  0x14   : > { %v1220_v20 = vld [vmem:[%s1554_s26 + $0x18] sm:$0xff]  ;;  %v1221_v24 = vld [vmem:[%s1554_s26 + $0x20] sm:$0xff]  ;;  %v1222_v28 = vld [vmem:[%s1554_s26 + $0x28] sm:$0xff] }
  0x15   : > { %v1228_v21 = vld [vmem:[%s1554_s26 + $0x58] sm:$0xff]  ;;  %v1229_v25 = vld [vmem:[%s1554_s26 + $0x60] sm:$0xff]  ;;  %v1230_v29 = vld [vmem:[%s1554_s26 + $0x68] sm:$0xff] }
  0x16   : > { %580 = vmatpush.bf16.msra.mxu0 %v1249_v7  ;;  %1445 = vmatpush.bf16.msra.mxu1 %v1249_v7  ;;  %v1236_v22 = vld [vmem:[%s1554_s26 + $0x98] sm:$0xff]  ;;  %v1237_v26 = vld [vmem:[%s1554_s26 + $0xa0] sm:$0xff]  ;;  %v1238_v30 = vld [vmem:[%s1554_s26 + $0xa8] sm:$0xff] }
  0x17   : > { %1446 = vmatpush.bf16.msra.mxu2 %v1249_v7  ;;  %1447 = vmatpush.bf16.msra.mxu3 %v1249_v7  ;;  %v1244_v23 = vld [vmem:[%s1554_s26 + $0xd8] sm:$0xff]  ;;  %v1245_v27 = vld [vmem:[%s1554_s26 + $0xe0] sm:$0xff]  ;;  %v1246_v31 = vld [vmem:[%s1554_s26 + $0xe8] sm:$0xff] }
  0x18   : > { %v1223_v32 = vld [vmem:[%s1554_s26 + $0x30] sm:$0xff]  ;;  %v1224_v36 = vld [vmem:[%s1554_s26 + $0x38] sm:$0xff] }
  0x19   : > { %1183 = vmatmul.msk.bf16.vlgmr.msra.gmra.mxu0 %vm469_vm2, %v1217_v8  ;;  %1191 = vmatmul.msk.bf16.vlgmr.msra.gmra.mxu1 %vm469_vm2, %v1225_v9  ;;  %v1231_v33 = vld [vmem:[%s1554_s26 + $0x70] sm:$0xff]  ;;  %v1232_v37 = vld [vmem:[%s1554_s26 + $0x78] sm:$0xff] }
  0x1a   : > { %1199 = vmatmul.msk.bf16.vlgmr.msra.gmra.mxu2 %vm469_vm2, %v1233_v10  ;;  %1207 = vmatmul.msk.bf16.vlgmr.msra.gmra.mxu3 %vm469_vm2, %v1241_v11  ;;  %v1239_v34 = vld [vmem:[%s1554_s26 + $0xb0] sm:$0xff]  ;;  %v1240_v38 = vld [vmem:[%s1554_s26 + $0xb8] sm:$0xff] }
  0x1b   : > { %v1247_v35 = vld [vmem:[%s1554_s26 + $0xf0] sm:$0xff]  ;;  %v1248_v39 = vld [vmem:[%s1554_s26 + $0xf8] sm:$0xff] }
  0x29   : > { %1184 = vmatmul.msk.bf16.gmra.mxu0 %vm469_vm2, %v1218_v12  ;;  %1192 = vmatmul.msk.bf16.gmra.mxu1 %vm469_vm2, %v1226_v13 }
  0x2a   : > { %1200 = vmatmul.msk.bf16.gmra.mxu2 %vm469_vm2, %v1234_v14  ;;  %1208 = vmatmul.msk.bf16.gmra.mxu3 %vm469_vm2, %v1242_v15 }
  0x39   : > { %1185 = vmatmul.msk.bf16.gmra.mxu0 %vm469_vm2, %v1219_v16  ;;  %1193 = vmatmul.msk.bf16.gmra.mxu1 %vm469_vm2, %v1227_v17 }
  0x3a   : > { %1201 = vmatmul.msk.bf16.gmra.mxu2 %vm469_vm2, %v1235_v18  ;;  %1209 = vmatmul.msk.bf16.gmra.mxu3 %vm469_vm2, %v1243_v19 }
  0x49   : > { %1186 = vmatmul.msk.bf16.gmra.mxu0 %vm469_vm2, %v1220_v20  ;;  %1194 = vmatmul.msk.bf16.gmra.mxu1 %vm469_vm2, %v1228_v21 }
  0x4a   : > { %1202 = vmatmul.msk.bf16.gmra.mxu2 %vm469_vm2, %v1236_v22  ;;  %1210 = vmatmul.msk.bf16.gmra.mxu3 %vm469_vm2, %v1244_v23 }
  0x59   : > { %1187 = vmatmul.msk.bf16.gmra.mxu0 %vm469_vm2, %v1221_v24  ;;  %1195 = vmatmul.msk.bf16.gmra.mxu1 %vm469_vm2, %v1229_v25 }
  0x5a   : > { %1203 = vmatmul.msk.bf16.gmra.mxu2 %vm469_vm2, %v1237_v26  ;;  %1211 = vmatmul.msk.bf16.gmra.mxu3 %vm469_vm2, %v1245_v27 }
  0x69   : > { %1188 = vmatmul.msk.bf16.gmra.mxu0 %vm469_vm2, %v1222_v28  ;;  %1196 = vmatmul.msk.bf16.gmra.mxu1 %vm469_vm2, %v1230_v29 }
  0x6a   : > { %1204 = vmatmul.msk.bf16.gmra.mxu2 %vm469_vm2, %v1238_v30  ;;  %1212 = vmatmul.msk.bf16.gmra.mxu3 %vm469_vm2, %v1246_v31 }
  0x79   : > { %1189 = vmatmul.msk.bf16.gmra.mxu0 %vm469_vm2, %v1223_v32  ;;  %1197 = vmatmul.msk.bf16.gmra.mxu1 %vm469_vm2, %v1231_v33 }
  0x7a   : > { %1205 = vmatmul.msk.bf16.gmra.mxu2 %vm469_vm2, %v1239_v34  ;;  %1213 = vmatmul.msk.bf16.gmra.mxu3 %vm469_vm2, %v1247_v35 }
  0x89   : > { %1190 = vmatmul.msk.bf16.gmra.mxu0 %vm469_vm2, %v1224_v36  ;;  %1198 = vmatmul.msk.bf16.gmra.mxu1 %vm469_vm2, %v1232_v37 }
  0x8a   : > { %1206 = vmatmul.msk.bf16.gmra.mxu2 %vm469_vm2, %v1240_v38  ;;  %1214 = vmatmul.msk.bf16.gmra.mxu3 %vm469_vm2, %v1248_v39 }
  0x96   : > { %v582_v40 = vpop.f32.mrf.mxu0  ;;  %v622_v41 = vpop.f32.mrf.mxu1 }
  0x97   : > { %v583_v43 = vadd.f32 %v1623_v42, %v582_v40  ;;  %v623_v44 = vadd.f32 %v1623_v42, %v622_v41 }
  0x99   : > { %v742_v51 = vmax.f32 %v583_v43, 0.0  ;;  %v758_v52 = vmax.f32 %v623_v44, 0.0 }
  0x9d   : > { %v662_v45 = vpop.f32.mrf.mxu2  ;;  %v702_v46 = vpop.f32.mrf.mxu3 }
  0x9e   : > { %v584_v47 = vpop.f32.mrf.mxu0  ;;  %v624_v48 = vpop.f32.mrf.mxu1  ;;  %v663_v57 = vadd.f32 %v1623_v42, %v662_v45  ;;  %v703_v58 = vadd.f32 %v1623_v42, %v702_v46 }
  0x9f   : > { %v585_v49 = vadd.f32 %v1623_v42, %v584_v47  ;;  %v625_v50 = vadd.f32 %v1623_v42, %v624_v48 }
  0xa0   : > { %v774_v1 = vmax.f32 %v663_v57, 0.0  ;;  %v790_v2 = vmax.f32 %v703_v58, 0.0 }
  0xa1   : > { %v743_v53 = vmax.f32 %v585_v49, 0.0  ;;  %v759_v54 = vmax.f32 %v625_v50, 0.0 }
  0xa3   : > { %v1254_v55 = vpack.c.bf16 %v743_v53, %v742_v51  ;;  %v1294_v56 = vpack.c.bf16 %v759_v54, %v758_v52 }
  0xa5   : > { %1255 = vst [vmem:[%s1634_s4] sm:$0xff] %v1254_v55   ;;  %v664_v59 = vpop.f32.mrf.mxu2  ;;  %v704_v60 = vpop.f32.mrf.mxu3 }
  0xa6   : > { %1418 = vst [vmem:[%s1634_s4 + $0x40] sm:$0xff] %v1294_v56   ;;  %v665_v61 = vadd.f32 %v1623_v42, %v664_v59  ;;  %v705_v62 = vadd.f32 %v1623_v42, %v704_v60  ;;  %v587_v63 = vpop.f32.mrf.mxu0  ;;  %v627_v0 = vpop.f32.mrf.mxu1 }
  0xa7   : > { %v588_v7 = vadd.f32 %v1623_v42, %v587_v63  ;;  %v628_v8 = vadd.f32 %v1623_v42, %v627_v0 }
  0xa8   : > { %v775_v3 = vmax.f32 %v665_v61, 0.0  ;;  %v791_v4 = vmax.f32 %v705_v62, 0.0 }
  0xa9   : > { %v744_v15 = vmax.f32 %v588_v7, 0.0  ;;  %v760_v16 = vmax.f32 %v628_v8, 0.0 }
  0xaa   : > { %v1334_v5 = vpack.c.bf16 %v775_v3, %v774_v1  ;;  %v1374_v6 = vpack.c.bf16 %v791_v4, %v790_v2 }
  0xac   : > { %1426 = vst [vmem:[%s1634_s4 + $0x80] sm:$0xff] %v1334_v5  }
  0xad   : > { %1434 = vst [vmem:[%s1634_s4 + $0xc0] sm:$0xff] %v1374_v6   ;;  %v667_v9 = vpop.f32.mrf.mxu2  ;;  %v707_v10 = vpop.f32.mrf.mxu3 }
  0xae   : > { %v589_v11 = vpop.f32.mrf.mxu0  ;;  %v629_v12 = vpop.f32.mrf.mxu1  ;;  %v668_v21 = vadd.f32 %v1623_v42, %v667_v9  ;;  %v708_v22 = vadd.f32 %v1623_v42, %v707_v10 }
  0xaf   : > { %v590_v13 = vadd.f32 %v1623_v42, %v589_v11  ;;  %v630_v14 = vadd.f32 %v1623_v42, %v629_v12 }
  0xb0   : > { %v776_v29 = vmax.f32 %v668_v21, 0.0  ;;  %v792_v30 = vmax.f32 %v708_v22, 0.0 }
  0xb1   : > { %v745_v17 = vmax.f32 %v590_v13, 0.0  ;;  %v761_v18 = vmax.f32 %v630_v14, 0.0 }
  0xb3   : > { %v1259_v19 = vpack.c.bf16 %v745_v17, %v744_v15  ;;  %v1299_v20 = vpack.c.bf16 %v761_v18, %v760_v16 }
  0xb5   : > { %1411 = vst [vmem:[%s1634_s4 + $0x8] sm:$0xff] %v1259_v19   ;;  %v669_v23 = vpop.f32.mrf.mxu2  ;;  %v709_v24 = vpop.f32.mrf.mxu3 }
  0xb6   : > { %1419 = vst [vmem:[%s1634_s4 + $0x48] sm:$0xff] %v1299_v20   ;;  %v670_v25 = vadd.f32 %v1623_v42, %v669_v23  ;;  %v710_v26 = vadd.f32 %v1623_v42, %v709_v24  ;;  %v592_v27 = vpop.f32.mrf.mxu0  ;;  %v632_v28 = vpop.f32.mrf.mxu1 }
  0xb7   : > { %v593_v35 = vadd.f32 %v1623_v42, %v592_v27  ;;  %v633_v36 = vadd.f32 %v1623_v42, %v632_v28 }
  0xb8   : > { %v777_v31 = vmax.f32 %v670_v25, 0.0  ;;  %v793_v32 = vmax.f32 %v710_v26, 0.0 }
  0xb9   : > { %v746_v44 = vmax.f32 %v593_v35, 0.0  ;;  %v762_v45 = vmax.f32 %v633_v36, 0.0 }
  0xba   : > { %v1339_v33 = vpack.c.bf16 %v777_v31, %v776_v29  ;;  %v1379_v34 = vpack.c.bf16 %v793_v32, %v792_v30 }
  0xbc   : > { %1427 = vst [vmem:[%s1634_s4 + $0x88] sm:$0xff] %v1339_v33  }
  0xbd   : > { %1435 = vst [vmem:[%s1634_s4 + $0xc8] sm:$0xff] %v1379_v34   ;;  %v672_v37 = vpop.f32.mrf.mxu2  ;;  %v712_v38 = vpop.f32.mrf.mxu3 }
  0xbe   : > { %v594_v39 = vpop.f32.mrf.mxu0  ;;  %v634_v40 = vpop.f32.mrf.mxu1  ;;  %v673_v50 = vadd.f32 %v1623_v42, %v672_v37  ;;  %v713_v51 = vadd.f32 %v1623_v42, %v712_v38 }
  0xbf   : > { %v595_v41 = vadd.f32 %v1623_v42, %v594_v39  ;;  %v635_v43 = vadd.f32 %v1623_v42, %v634_v40 }
  0xc0   : > { %v778_v58 = vmax.f32 %v673_v50, 0.0  ;;  %v794_v59 = vmax.f32 %v713_v51, 0.0 }
  0xc1   : > { %v747_v46 = vmax.f32 %v595_v41, 0.0  ;;  %v763_v47 = vmax.f32 %v635_v43, 0.0 }
  0xc3   : > { %v1264_v48 = vpack.c.bf16 %v747_v46, %v746_v44  ;;  %v1304_v49 = vpack.c.bf16 %v763_v47, %v762_v45 }
  0xc5   : > { %1412 = vst [vmem:[%s1634_s4 + $0x10] sm:$0xff] %v1264_v48   ;;  %v674_v52 = vpop.f32.mrf.mxu2  ;;  %v714_v53 = vpop.f32.mrf.mxu3 }
  0xc6   : > { %1420 = vst [vmem:[%s1634_s4 + $0x50] sm:$0xff] %v1304_v49   ;;  %v675_v54 = vadd.f32 %v1623_v42, %v674_v52  ;;  %v715_v55 = vadd.f32 %v1623_v42, %v714_v53  ;;  %v597_v56 = vpop.f32.mrf.mxu0  ;;  %v637_v57 = vpop.f32.mrf.mxu1 }
  0xc7   : > { %v598_v0 = vadd.f32 %v1623_v42, %v597_v56  ;;  %v638_v1 = vadd.f32 %v1623_v42, %v637_v57 }
  0xc8   : > { %v779_v60 = vmax.f32 %v675_v54, 0.0  ;;  %v795_v61 = vmax.f32 %v715_v55, 0.0 }
  0xc9   : > { %v748_v8 = vmax.f32 %v598_v0, 0.0  ;;  %v764_v9 = vmax.f32 %v638_v1, 0.0 }
  0xca   : > { %v1344_v62 = vpack.c.bf16 %v779_v60, %v778_v58  ;;  %v1384_v63 = vpack.c.bf16 %v795_v61, %v794_v59 }
  0xcc   : > { %1428 = vst [vmem:[%s1634_s4 + $0x90] sm:$0xff] %v1344_v62  }
  0xcd   : > { %1436 = vst [vmem:[%s1634_s4 + $0xd0] sm:$0xff] %v1384_v63   ;;  %v677_v2 = vpop.f32.mrf.mxu2  ;;  %v717_v3 = vpop.f32.mrf.mxu3 }
  0xce   : > { %v599_v4 = vpop.f32.mrf.mxu0  ;;  %v639_v5 = vpop.f32.mrf.mxu1  ;;  %v678_v14 = vadd.f32 %v1623_v42, %v677_v2  ;;  %v718_v15 = vadd.f32 %v1623_v42, %v717_v3 }
  0xcf   : > { %v600_v6 = vadd.f32 %v1623_v42, %v599_v4  ;;  %v640_v7 = vadd.f32 %v1623_v42, %v639_v5 }
  0xd0   : > { %v780_v22 = vmax.f32 %v678_v14, 0.0  ;;  %v796_v23 = vmax.f32 %v718_v15, 0.0 }
  0xd1   : > { %v749_v10 = vmax.f32 %v600_v6, 0.0  ;;  %v765_v11 = vmax.f32 %v640_v7, 0.0 }
  0xd3   : > { %v1269_v12 = vpack.c.bf16 %v749_v10, %v748_v8  ;;  %v1309_v13 = vpack.c.bf16 %v765_v11, %v764_v9 }
  0xd5   : > { %1413 = vst [vmem:[%s1634_s4 + $0x18] sm:$0xff] %v1269_v12   ;;  %v679_v16 = vpop.f32.mrf.mxu2  ;;  %v719_v17 = vpop.f32.mrf.mxu3 }
  0xd6   : > { %1421 = vst [vmem:[%s1634_s4 + $0x58] sm:$0xff] %v1309_v13   ;;  %v680_v18 = vadd.f32 %v1623_v42, %v679_v16  ;;  %v720_v19 = vadd.f32 %v1623_v42, %v719_v17  ;;  %v602_v20 = vpop.f32.mrf.mxu0  ;;  %v642_v21 = vpop.f32.mrf.mxu1 }
  0xd7   : > { %v603_v28 = vadd.f32 %v1623_v42, %v602_v20  ;;  %v643_v29 = vadd.f32 %v1623_v42, %v642_v21 }
  0xd8   : > { %v781_v24 = vmax.f32 %v680_v18, 0.0  ;;  %v797_v25 = vmax.f32 %v720_v19, 0.0 }
  0xd9   : > { %v750_v36 = vmax.f32 %v603_v28, 0.0  ;;  %v766_v37 = vmax.f32 %v643_v29, 0.0 }
  0xda   : > { %v1349_v26 = vpack.c.bf16 %v781_v24, %v780_v22  ;;  %v1389_v27 = vpack.c.bf16 %v797_v25, %v796_v23 }
  0xdc   : > { %1429 = vst [vmem:[%s1634_s4 + $0x98] sm:$0xff] %v1349_v26  }
  0xdd   : > { %1437 = vst [vmem:[%s1634_s4 + $0xd8] sm:$0xff] %v1389_v27   ;;  %v682_v30 = vpop.f32.mrf.mxu2  ;;  %v722_v31 = vpop.f32.mrf.mxu3 }
  0xde   : > { %v604_v32 = vpop.f32.mrf.mxu0  ;;  %v644_v33 = vpop.f32.mrf.mxu1  ;;  %v683_v43 = vadd.f32 %v1623_v42, %v682_v30  ;;  %v723_v44 = vadd.f32 %v1623_v42, %v722_v31 }
  0xdf   : > { %v605_v34 = vadd.f32 %v1623_v42, %v604_v32  ;;  %v645_v35 = vadd.f32 %v1623_v42, %v644_v33 }
  0xe0   : > { %v782_v51 = vmax.f32 %v683_v43, 0.0  ;;  %v798_v52 = vmax.f32 %v723_v44, 0.0 }
  0xe1   : > { %v751_v38 = vmax.f32 %v605_v34, 0.0  ;;  %v767_v39 = vmax.f32 %v645_v35, 0.0 }
  0xe3   : > { %v1274_v40 = vpack.c.bf16 %v751_v38, %v750_v36  ;;  %v1314_v41 = vpack.c.bf16 %v767_v39, %v766_v37 }
  0xe5   : > { %1414 = vst [vmem:[%s1634_s4 + $0x20] sm:$0xff] %v1274_v40   ;;  %v684_v45 = vpop.f32.mrf.mxu2  ;;  %v724_v46 = vpop.f32.mrf.mxu3 }
  0xe6   : > { %1422 = vst [vmem:[%s1634_s4 + $0x60] sm:$0xff] %v1314_v41   ;;  %v685_v47 = vadd.f32 %v1623_v42, %v684_v45  ;;  %v725_v48 = vadd.f32 %v1623_v42, %v724_v46  ;;  %v607_v49 = vpop.f32.mrf.mxu0  ;;  %v647_v50 = vpop.f32.mrf.mxu1 }
  0xe7   : > { %v608_v57 = vadd.f32 %v1623_v42, %v607_v49  ;;  %v648_v58 = vadd.f32 %v1623_v42, %v647_v50 }
  0xe8   : > { %v783_v53 = vmax.f32 %v685_v47, 0.0  ;;  %v799_v54 = vmax.f32 %v725_v48, 0.0 }
  0xe9   : > { %v752_v1 = vmax.f32 %v608_v57, 0.0  ;;  %v768_v2 = vmax.f32 %v648_v58, 0.0 }
  0xea   : > { %v1354_v55 = vpack.c.bf16 %v783_v53, %v782_v51  ;;  %v1394_v56 = vpack.c.bf16 %v799_v54, %v798_v52 }
  0xec   : > { %1430 = vst [vmem:[%s1634_s4 + $0xa0] sm:$0xff] %v1354_v55  }
  0xed   : > { %1438 = vst [vmem:[%s1634_s4 + $0xe0] sm:$0xff] %v1394_v56   ;;  %v687_v59 = vpop.f32.mrf.mxu2  ;;  %v727_v60 = vpop.f32.mrf.mxu3 }
  0xee   : > { %v609_v61 = vpop.f32.mrf.mxu0  ;;  %v649_v62 = vpop.f32.mrf.mxu1  ;;  %v688_v7 = vadd.f32 %v1623_v42, %v687_v59  ;;  %v728_v8 = vadd.f32 %v1623_v42, %v727_v60 }
  0xef   : > { %v610_v63 = vadd.f32 %v1623_v42, %v609_v61  ;;  %v650_v0 = vadd.f32 %v1623_v42, %v649_v62 }
  0xf0   : > { %v784_v15 = vmax.f32 %v688_v7, 0.0  ;;  %v800_v16 = vmax.f32 %v728_v8, 0.0 }
  0xf1   : > { %v753_v3 = vmax.f32 %v610_v63, 0.0  ;;  %v769_v4 = vmax.f32 %v650_v0, 0.0 }
  0xf3   : > { %v1279_v5 = vpack.c.bf16 %v753_v3, %v752_v1  ;;  %v1319_v6 = vpack.c.bf16 %v769_v4, %v768_v2 }
  0xf5   : > { %1415 = vst [vmem:[%s1634_s4 + $0x28] sm:$0xff] %v1279_v5   ;;  %v689_v9 = vpop.f32.mrf.mxu2  ;;  %v729_v10 = vpop.f32.mrf.mxu3 }
  0xf6   : > { %1423 = vst [vmem:[%s1634_s4 + $0x68] sm:$0xff] %v1319_v6   ;;  %v690_v11 = vadd.f32 %v1623_v42, %v689_v9  ;;  %v730_v12 = vadd.f32 %v1623_v42, %v729_v10  ;;  %v612_v13 = vpop.f32.mrf.mxu0  ;;  %v652_v14 = vpop.f32.mrf.mxu1 }
  0xf7   : > { %v613_v21 = vadd.f32 %v1623_v42, %v612_v13  ;;  %v653_v22 = vadd.f32 %v1623_v42, %v652_v14 }
  0xf8   : > { %v785_v17 = vmax.f32 %v690_v11, 0.0  ;;  %v801_v18 = vmax.f32 %v730_v12, 0.0 }
  0xf9   : > { %v754_v29 = vmax.f32 %v613_v21, 0.0  ;;  %v770_v30 = vmax.f32 %v653_v22, 0.0 }
  0xfa   : > { %v1359_v19 = vpack.c.bf16 %v785_v17, %v784_v15  ;;  %v1399_v20 = vpack.c.bf16 %v801_v18, %v800_v16 }
  0xfc   : > { %1431 = vst [vmem:[%s1634_s4 + $0xa8] sm:$0xff] %v1359_v19  }
  0xfd   : > { %1439 = vst [vmem:[%s1634_s4 + $0xe8] sm:$0xff] %v1399_v20   ;;  %v692_v23 = vpop.f32.mrf.mxu2  ;;  %v732_v24 = vpop.f32.mrf.mxu3 }
  0xfe   : > { %v614_v25 = vpop.f32.mrf.mxu0  ;;  %v654_v26 = vpop.f32.mrf.mxu1  ;;  %v693_v35 = vadd.f32 %v1623_v42, %v692_v23  ;;  %v733_v36 = vadd.f32 %v1623_v42, %v732_v24 }
  0xff   : > { %v615_v27 = vadd.f32 %v1623_v42, %v614_v25  ;;  %v655_v28 = vadd.f32 %v1623_v42, %v654_v26 }
 0x100   : > { %v786_v44 = vmax.f32 %v693_v35, 0.0  ;;  %v802_v45 = vmax.f32 %v733_v36, 0.0 }
 0x101   : > { %v755_v31 = vmax.f32 %v615_v27, 0.0  ;;  %v771_v32 = vmax.f32 %v655_v28, 0.0 }
 0x103   : > { %v1284_v33 = vpack.c.bf16 %v755_v31, %v754_v29  ;;  %v1324_v34 = vpack.c.bf16 %v771_v32, %v770_v30 }
 0x105   : > { %1416 = vst [vmem:[%s1634_s4 + $0x30] sm:$0xff] %v1284_v33   ;;  %v694_v37 = vpop.f32.mrf.mxu2  ;;  %v734_v38 = vpop.f32.mrf.mxu3 }
 0x106   : > { %1424 = vst [vmem:[%s1634_s4 + $0x70] sm:$0xff] %v1324_v34   ;;  %v695_v39 = vadd.f32 %v1623_v42, %v694_v37  ;;  %v735_v40 = vadd.f32 %v1623_v42, %v734_v38  ;;  %v617_v41 = vpop.f32.mrf.mxu0  ;;  %v657_v43 = vpop.f32.mrf.mxu1 }
 0x107   : > { %v618_v50 = vadd.f32 %v1623_v42, %v617_v41  ;;  %v658_v51 = vadd.f32 %v1623_v42, %v657_v43 }
 0x108   : > { %v787_v46 = vmax.f32 %v695_v39, 0.0  ;;  %v803_v47 = vmax.f32 %v735_v40, 0.0 }
 0x109   : > { %v756_v58 = vmax.f32 %v618_v50, 0.0  ;;  %v772_v59 = vmax.f32 %v658_v51, 0.0 }
 0x10a   : > { %v1364_v48 = vpack.c.bf16 %v787_v46, %v786_v44  ;;  %v1404_v49 = vpack.c.bf16 %v803_v47, %v802_v45 }
 0x10c   : > { %1432 = vst [vmem:[%s1634_s4 + $0xb0] sm:$0xff] %v1364_v48  }
 0x10d   : > { %1440 = vst [vmem:[%s1634_s4 + $0xf0] sm:$0xff] %v1404_v49   ;;  %v697_v52 = vpop.f32.mrf.mxu2  ;;  %v737_v53 = vpop.f32.mrf.mxu3 }
 0x10e   : > { %v619_v54 = vpop.f32.mrf.mxu0  ;;  %v659_v55 = vpop.f32.mrf.mxu1  ;;  %v698_v0 = vadd.f32 %v1623_v42, %v697_v52  ;;  %v738_v1 = vadd.f32 %v1623_v42, %v737_v53 }
 0x10f   : > { %v620_v56 = vadd.f32 %v1623_v42, %v619_v54  ;;  %v660_v57 = vadd.f32 %v1623_v42, %v659_v55 }
 0x110   : > { %v788_v6 = vmax.f32 %v698_v0, 0.0  ;;  %v804_v7 = vmax.f32 %v738_v1, 0.0 }
 0x111   : > { %v757_v60 = vmax.f32 %v620_v56, 0.0  ;;  %v773_v61 = vmax.f32 %v660_v57, 0.0 }
 0x113   : > { %v1289_v62 = vpack.c.bf16 %v757_v60, %v756_v58  ;;  %v1329_v63 = vpack.c.bf16 %v773_v61, %v772_v59 }
 0x115   : > { %1417 = vst [vmem:[%s1634_s4 + $0x38] sm:$0xff] %v1289_v62   ;;  %v699_v2 = vpop.f32.mrf.mxu2  ;;  %v739_v3 = vpop.f32.mrf.mxu3 }
 0x116   : > { %1425 = vst [vmem:[%s1634_s4 + $0x78] sm:$0xff] %v1329_v63   ;;  %v700_v4 = vadd.f32 %v1623_v42, %v699_v2  ;;  %v740_v5 = vadd.f32 %v1623_v42, %v739_v3 }
 0x118   : > { %v789_v8 = vmax.f32 %v700_v4, 0.0  ;;  %v805_v9 = vmax.f32 %v740_v5, 0.0 }
 0x11a   : > { %v1369_v10 = vpack.c.bf16 %v789_v8, %v788_v6  ;;  %v1409_v11 = vpack.c.bf16 %v805_v9, %v804_v7 }
 0x11c   : > { %1433 = vst [vmem:[%s1634_s4 + $0xb8] sm:$0xff] %v1369_v10  }
 0x11d   : > { %1441 = vst [vmem:[%s1634_s4 + $0xf8] sm:$0xff] %v1409_v11  }
 0x11e PF: > { %s13_s14 = sadd.s32 1, %s1496_s14   ;;  %s1741_s12 = smov %s1492_s13 }
 0x11f   : > { %p10_p5 = scmp.ge.s32.totalorder %s13_s14, 66   ;;  %s1742_s13 = smov %s1744_s15 }
 0x121   :  { %12 = sbr.rel (!%p10_p5) target bundleno = 2 (0x2), region = 68 }

</bundles_post_ra>
